<compile_context>
chip_gen: v5e
topology: v5e:2x2
jax: 0.10.0
libtpu: 0.0.40
codegen_flags: <defaults>
</compile_context>

<pallas_src>
import functools

import jax
import jax.numpy as jnp
from jax.experimental import pallas as pl
from jax.experimental.pallas import tpu as pltpu

LANE = 128        # TPU lane width; hidden/output widths are zero-padded to this
HIDDEN = 24
BIAS_ROWS = 8     # each bias lives in an 8-row (sublane-aligned) slab, row 0 valid


def _round_up(n, m):
    return ((n + m - 1) // m) * m


def pack_params(w1, b1, w2, b2, w3, b3):
    """Pack all weights/biases into a single lane-dense (rows, 128) f32 blob.

    Row layout (all offsets are multiples of 8, so static slices inside the
    kernel never cross an (8,128) tile boundary):
      [0,              s_pad)           w1  (num_states, 24) zero-padded to 128 lanes
      [s_pad,          s_pad+8)         b1  (row 0 valid)
      [..,             .. + 128)        w2  (24, 24) zero-padded to (128, 128)
      [..,             .. + 8)          b2
      [..,             .. + 128)        w3  (24, num_actions) zero-padded to (128, 128)
      [..,             .. + 8)          b3
    """
    s = w1.shape[0]
    s_pad = _round_up(s, 8)

    def lane_pad(a):
        return jnp.pad(a.astype(jnp.float32), ((0, 0), (0, LANE - a.shape[1])))

    def weight_block(w, rows_pad):
        w = lane_pad(w)
        return jnp.pad(w, ((0, rows_pad - w.shape[0]), (0, 0)))

    def bias_block(b):
        b = lane_pad(b.reshape(1, -1))
        return jnp.pad(b, ((0, BIAS_ROWS - 1), (0, 0)))

    blob = jnp.concatenate(
        [
            weight_block(w1, s_pad),
            bias_block(b1),
            weight_block(w2, LANE),
            bias_block(b2),
            weight_block(w3, LANE),
            bias_block(b3),
        ],
        axis=0,
    )
    return blob, s_pad


def _mlp_kernel(x_ref, p_ref, o_ref, *, s_pad):
    # Static, sublane-aligned row offsets into the packed parameter blob.
    o_w1 = 0
    o_b1 = o_w1 + s_pad
    o_w2 = o_b1 + BIAS_ROWS
    o_b2 = o_w2 + LANE
    o_w3 = o_b2 + BIAS_ROWS
    o_b3 = o_w3 + LANE

    x = x_ref[...]                                  # (tile_b, s_pad)
    w1 = p_ref[o_w1:o_w1 + s_pad, :]                # (s_pad, 128)
    b1 = p_ref[o_b1:o_b1 + 1, :]                    # (1, 128)
    w2 = p_ref[o_w2:o_w2 + LANE, :]                 # (128, 128)
    b2 = p_ref[o_b2:o_b2 + 1, :]
    w3 = p_ref[o_w3:o_w3 + LANE, :]                 # (128, 128)
    b3 = p_ref[o_b3:o_b3 + 1, :]

    # Three MXU matmuls (f32 accumulate) + VPU bias/ReLU, all resident in VMEM.
    h1 = jnp.dot(x, w1, preferred_element_type=jnp.float32) + b1
    h1 = jnp.maximum(h1, 0.0)
    h2 = jnp.dot(h1, w2, preferred_element_type=jnp.float32) + b2
    h2 = jnp.maximum(h2, 0.0)
    out = jnp.dot(h2, w3, preferred_element_type=jnp.float32) + b3
    o_ref[...] = out.astype(o_ref.dtype)            # lane-dense (tile_b, 128) store


def mlp_forward(x, blob, s_pad, num_actions, *, block_batch=256):
    batch, s = x.shape
    if s != s_pad:  # keep x's contracting dim consistent with the packed w1 rows
        x = jnp.pad(x, ((0, 0), (0, s_pad - s)))

    # Small batches run as a single grid step; large, evenly divisible batches
    # are tiled over a parallel batch axis (sharded across TCs on v7x).
    if batch <= block_batch or batch % block_batch != 0:
        tile_b = batch
    else:
        tile_b = block_batch
    grid = (batch // tile_b,)
    p_rows = blob.shape[0]

    flops = 2 * batch * (s_pad * LANE + LANE * LANE + LANE * LANE)
    bytes_accessed = x.size * 4 + blob.size * 4 + batch * LANE * 4

    out_padded = pl.pallas_call(
        functools.partial(_mlp_kernel, s_pad=s_pad),
        out_shape=jax.ShapeDtypeStruct((batch, LANE), jnp.float32),
        grid_spec=pltpu.PrefetchScalarGridSpec(
            num_scalar_prefetch=0,
            grid=grid,
            in_specs=[
                pl.BlockSpec((tile_b, s_pad), lambda i: (i, 0)),
                # Single packed parameter blob; constant index_map keeps it
                # resident in VMEM across all batch tiles.
                pl.BlockSpec((p_rows, LANE), lambda i: (0, 0)),
            ],
            out_specs=pl.BlockSpec((tile_b, LANE), lambda i: (i, 0)),
        ),
        compiler_params=pltpu.CompilerParams(
            dimension_semantics=("parallel",),
            vmem_limit_bytes=8 * 1024 * 1024,
        ),
        cost_estimate=pl.CostEstimate(
            flops=flops, transcendentals=0, bytes_accessed=bytes_accessed
        ),
    )(x, blob)

    # Lane-dense (batch, 128) result; the real Q-values are the first lanes.
    return out_padded[:, :num_actions]


def init_params(key, num_states, num_actions, hidden=HIDDEN):
    """Deterministic init mimicking PyTorch's default Linear init
    (uniform(-1/sqrt(fan_in), 1/sqrt(fan_in))). Weights are stored
    pre-transposed as (in_features, out_features)."""
    def linear_params(k, fan_in, fan_out):
        kw, kb = jax.random.split(k)
        bound = 1.0 / jnp.sqrt(jnp.float32(fan_in))
        w = jax.random.uniform(kw, (fan_in, fan_out), jnp.float32, -bound, bound)
        b = jax.random.uniform(kb, (1, fan_out), jnp.float32, -bound, bound)
        return w, b

    k1, k2, k3 = jax.random.split(key, 3)
    w1, b1 = linear_params(k1, num_states, hidden)
    w2, b2 = linear_params(k2, hidden, hidden)
    w3, b3 = linear_params(k3, hidden, num_actions)
    return w1, b1, w2, b2, w3, b3


def mlp_ref(x, w1, b1, w2, b2, w3, b3):
    """Pure-JAX reference for correctness checking."""
    h1 = jnp.maximum(x @ w1 + b1, 0.0)
    h2 = jnp.maximum(h1 @ w2 + b2, 0.0)
    return h2 @ w3 + b3


if __name__ == "__main__":
    # FrozenLake 4x4: num_states=16, num_actions=4
    num_states, num_actions = 16, 4

    key = jax.random.PRNGKey(0)
    kx, kp, kx2 = jax.random.split(key, 3)

    params = init_params(kp, num_states, num_actions)
    blob, s_pad = pack_params(*params)

    # Small batch: single grid step.
    batch = 8
    x = jax.random.normal(kx, (batch, num_states), dtype=jnp.float32)
    out = jax.block_until_ready(mlp_forward(x, blob, s_pad, num_actions))
    ref = mlp_ref(x, *params)
    assert out.shape == (batch, num_actions)
    assert jnp.allclose(out, ref, atol=1e-5, rtol=1e-5), "mismatch vs JAX reference (batch=8)"

    # Larger batch: exercises the parallel batch grid (2 tiles of 256 rows).
    batch2 = 512
    x2 = jax.random.normal(kx2, (batch2, num_states), dtype=jnp.float32)
    out2 = jax.block_until_ready(mlp_forward(x2, blob, s_pad, num_actions))
    ref2 = mlp_ref(x2, *params)
    assert out2.shape == (batch2, num_actions)
    assert jnp.allclose(out2, ref2, atol=1e-4, rtol=1e-4), "mismatch vs JAX reference (batch=512)"

    print("KERNEL_OK")
</pallas_src>

<mosaic_0001>
module attributes {stable_mosaic.version = 11 : i64} {
  func.func @_mlp_kernel(%arg0: i32, %arg1: memref<8x16xf32, #tpu.memory_space<vmem>>, %arg2: memref<296x128xf32, #tpu.memory_space<vmem>>, %arg3: memref<8x128xf32, #tpu.memory_space<vmem>>) attributes {dimension_semantics = [#tpu.dimension_semantics<parallel>], iteration_bounds = array<i64: 1>, scalar_prefetch = 0 : i64, scratch_operands = 0 : i64, tpu.core_type = #tpu.core_type<tc>, window_params = [{transform_indices = @transform_0, window_bounds = array<i64: 8, 16>}, {pipeline_mode = #tpu.pipeline_mode<synchronous>, transform_indices = @transform_1, window_bounds = array<i64: 296, 128>}, {transform_indices = @transform_2, window_bounds = array<i64: 8, 128>}]} {
    %c0 = arith.constant 0 : index
    %c0_0 = arith.constant 0 : index
    %0 = vector.load %arg1[%c0, %c0_0] : memref<8x16xf32, #tpu.memory_space<vmem>>, vector<8x16xf32>
    %c0_1 = arith.constant 0 : index
    %c0_2 = arith.constant 0 : index
    %1 = vector.load %arg2[%c0_1, %c0_2] : memref<296x128xf32, #tpu.memory_space<vmem>>, vector<16x128xf32>
    %c16 = arith.constant 16 : index
    %c0_3 = arith.constant 0 : index
    %2 = vector.load %arg2[%c16, %c0_3] : memref<296x128xf32, #tpu.memory_space<vmem>>, vector<1x128xf32>
    %c24 = arith.constant 24 : index
    %c0_4 = arith.constant 0 : index
    %3 = vector.load %arg2[%c24, %c0_4] : memref<296x128xf32, #tpu.memory_space<vmem>>, vector<128x128xf32>
    %c152 = arith.constant 152 : index
    %c0_5 = arith.constant 0 : index
    %4 = vector.load %arg2[%c152, %c0_5] : memref<296x128xf32, #tpu.memory_space<vmem>>, vector<1x128xf32>
    %c160 = arith.constant 160 : index
    %c0_6 = arith.constant 0 : index
    %5 = vector.load %arg2[%c160, %c0_6] : memref<296x128xf32, #tpu.memory_space<vmem>>, vector<128x128xf32>
    %c288 = arith.constant 288 : index
    %c0_7 = arith.constant 0 : index
    %6 = vector.load %arg2[%c288, %c0_7] : memref<296x128xf32, #tpu.memory_space<vmem>>, vector<1x128xf32>
    %cst = arith.constant dense<0.000000e+00> : vector<8x128xf32>
    %7 = tpu.matmul %0, %1, %cst {dimension_numbers = #tpu.dot_dimension_numbers<[1], [0], [0], [1], [0, 0, 1, 1], [], []>} : vector<8x16xf32>, vector<16x128xf32>, vector<8x128xf32> -> vector<8x128xf32>
    %8 = vector.broadcast %2 : vector<1x128xf32> to vector<8x128xf32>
    %9 = arith.addf %7, %8 : vector<8x128xf32>
    %cst_8 = arith.constant 0.000000e+00 : f32
    %10 = vector.broadcast %cst_8 : f32 to vector<8x128xf32>
    %11 = arith.maximumf %9, %10 : vector<8x128xf32>
    %cst_9 = arith.constant dense<0.000000e+00> : vector<8x128xf32>
    %12 = tpu.matmul %11, %3, %cst_9 {dimension_numbers = #tpu.dot_dimension_numbers<[1], [0], [0], [1], [0, 0, 1, 1], [], []>} : vector<8x128xf32>, vector<128x128xf32>, vector<8x128xf32> -> vector<8x128xf32>
    %13 = vector.broadcast %4 : vector<1x128xf32> to vector<8x128xf32>
    %14 = arith.addf %12, %13 : vector<8x128xf32>
    %cst_10 = arith.constant 0.000000e+00 : f32
    %15 = vector.broadcast %cst_10 : f32 to vector<8x128xf32>
    %16 = arith.maximumf %14, %15 : vector<8x128xf32>
    %cst_11 = arith.constant dense<0.000000e+00> : vector<8x128xf32>
    %17 = tpu.matmul %16, %5, %cst_11 {dimension_numbers = #tpu.dot_dimension_numbers<[1], [0], [0], [1], [0, 0, 1, 1], [], []>} : vector<8x128xf32>, vector<128x128xf32>, vector<8x128xf32> -> vector<8x128xf32>
    %18 = vector.broadcast %6 : vector<1x128xf32> to vector<8x128xf32>
    %19 = arith.addf %17, %18 : vector<8x128xf32>
    %c0_12 = arith.constant 0 : index
    %c0_13 = arith.constant 0 : index
    %20 = vector.load %arg3[%c0_12, %c0_13] : memref<8x128xf32, #tpu.memory_space<vmem>>, vector<8x128xf32>
    tpu.vector_store %arg3[%c0_12, %c0_13], %19 {strides = array<i32>} : memref<8x128xf32, #tpu.memory_space<vmem>>, vector<8x128xf32>,
    return
  }
  func.func @transform_0(%arg0: i32) -> (i32, i32) {
    %c0_i32 = arith.constant 0 : i32
    %c0_i32_0 = arith.constant 0 : i32
    return %arg0, %c0_i32 : i32, i32
  }
  func.func @transform_1(%arg0: i32) -> (i32, i32) {
    %c0_i32 = arith.constant 0 : i32
    %c0_i32_0 = arith.constant 0 : i32
    %c0_i32_1 = arith.constant 0 : i32
    return %c0_i32, %c0_i32_0 : i32, i32
  }
  func.func @transform_2(%arg0: i32) -> (i32, i32) {
    %c0_i32 = arith.constant 0 : i32
    %c0_i32_0 = arith.constant 0 : i32
    return %arg0, %c0_i32 : i32, i32
  }
}

</mosaic_0001>

<bundles_post_ra>
// kernel: tpu_custom_call.1
= control target key start
LH: loop header
LB: loop body
LE: loop exit
PB: predicated region body
PF: predicated region fallthrough
CT: control target
= control target key end

     0   :  { %7 = vsyncpa [#allocation3], 0  ;;  %s284_s0 = inlined_call_operand.hbm [shape: f32[8,16], index: 0, kind: input, shape index: {}]   ;;  %s285_s1 = inlined_call_operand.hbm [shape: f32[296,128], index: 1, kind: input, shape index: {}]   ;;  %s286_s2 = inlined_call_operand.hbm [shape: f32[8,128], index: 2, kind: output, shape index: {}]  }
   0x1   :  { %8 = vsyncpa [#allocation6], 0 }
   0x2   :  { %9 = vsyncpa [#allocation4], 0  ;;  %s15_s11 = sshll.u32 %s284_s0, 4  ;;  %s255_s12 = smov [#allocation2]   ;;  %s16_s11 = int_to_ptr.hbm [resolvable:$true] %s15_s11 }
   0x3   :  { %s17_s13 = sshll.u32 %s255_s12, 4  ;;  %s25_s16 = sshll.u32 %s285_s1, 4  ;;  %s18_s13 = int_to_ptr.vmem [resolvable:$true] %s17_s13  ;;  %s26_s16 = int_to_ptr.hbm [resolvable:$true] %s25_s16 }
   0x4   :  { %20 = dma.hbm_to_vmem [thread:$0]  %s16_s11, 128, %s18_s13, [#allocation3]  }
   0x5   :  { %s256_s17 = smov [#allocation5]   ;;  %s257_s19 = smov 128  }
   0x6   :  { %s27_s18 = sshll.u32 %s256_s17, 4  ;;  %s258_s20 = smov 8   ;;  %s28_s18 = int_to_ptr.vmem [resolvable:$true] %s27_s18 }
   0x7   :  { %33 = dma.hbm_to_vmem [thread:$0]  %s26_s16, 4736, %s28_s18, [#allocation6], %s257_s19, %s257_s19, %s258_s20  }
   0x8   :  { %249 = dma.done.wait [#allocation3], 128  }
   0x9   :  { %250 = vsyncadd [#allocation3], 4294967168 }
   0xa   :  { %251 = dma.done.wait [#allocation6], 4736  }
   0xb   :  { %252 = vsyncadd [#allocation6], 4294962560  ;;  %v44_v0 = vld [vmem:[#allocation5 + $0x8] sm:$0xff]  ;;  %v43_v1 = vld [vmem:[#allocation5] sm:$0xff]  ;;  %vm81_vm0 = vcmask 130048   ;;  %s259_s0 = smov [#allocation7]  }
   0xc   :  { %99 = vmatpush.msra.mxu0 %v44_v0  ;;  %v42_v2 = vld [vmem:[#allocation2] sm:$0xff]  ;;  %v61_v3 = vld [vmem:[#allocation5 + $0x90] sm:$0xff]  ;;  %v60_v4 = vld [vmem:[#allocation5 + $0x88] sm:$0xff]  ;;  %s155_s1 = sshll.u32 %s259_s0, 4  ;;  %s157_s23 = sshll.u32 %s286_s2, 4  ;;  %s156_s1 = int_to_ptr.vmem [resolvable:$true] %s155_s1  ;;  %s158_s23 = int_to_ptr.hbm [resolvable:$true] %s157_s23 }
   0xd   :  { %107 = vmatpush.msra.mxu1 %v61_v3  ;;  %v59_v5 = vld [vmem:[#allocation5 + $0x80] sm:$0xff]  ;;  %v58_v6 = vld [vmem:[#allocation5 + $0x78] sm:$0xff]  ;;  %v57_v7 = vld [vmem:[#allocation5 + $0x70] sm:$0xff] }
   0xe   :  { %100 = vmatpush.msra.mxu0 %v43_v1  ;;  %v56_v8 = vld [vmem:[#allocation5 + $0x68] sm:$0xff]  ;;  %v55_v9 = vld [vmem:[#allocation5 + $0x60] sm:$0xff]  ;;  %v54_v10 = vld [vmem:[#allocation5 + $0x58] sm:$0xff] }
   0xf   :  { %168 = vmatmul.msk.f32.vlgmr.msra.gmra.mxu0 %vm81_vm0, %v42_v2  ;;  %108 = vmatpush.msra.mxu1 %v60_v4  ;;  %v53_v11 = vld [vmem:[#allocation5 + $0x50] sm:$0xff]  ;;  %v52_v12 = vld [vmem:[#allocation5 + $0x48] sm:$0xff]  ;;  %v51_v13 = vld [vmem:[#allocation5 + $0x40] sm:$0xff] }
  0x10   :  { %v50_v14 = vld [vmem:[#allocation5 + $0x38] sm:$0xff]  ;;  %v49_v15 = vld [vmem:[#allocation5 + $0x30] sm:$0xff]  ;;  %v48_v16 = vld [vmem:[#allocation5 + $0x28] sm:$0xff] }
  0x11   :  { %109 = vmatpush.msra.mxu1 %v59_v5  ;;  %v47_v17 = vld [vmem:[#allocation5 + $0x20] sm:$0xff]  ;;  %v46_v18 = vld [vmem:[#allocation5 + $0x18] sm:$0xff]  ;;  %v77_v20 = vld [vmem:[#allocation5 + $0x110] sm:$0xff] }
  0x12   :  { %v78_v19 = vld [vmem:[#allocation5 + $0x118] sm:$0xff]  ;;  %v76_v21 = vld [vmem:[#allocation5 + $0x108] sm:$0xff]  ;;  %v75_v22 = vld [vmem:[#allocation5 + $0x100] sm:$0xff] }
  0x13   :  { %110 = vmatpush.msra.mxu1 %v58_v6  ;;  %129 = vmatpush.msra.mxu2 %v78_v19  ;;  %v74_v23 = vld [vmem:[#allocation5 + $0xf8] sm:$0xff]  ;;  %v73_v24 = vld [vmem:[#allocation5 + $0xf0] sm:$0xff]  ;;  %v72_v25 = vld [vmem:[#allocation5 + $0xe8] sm:$0xff] }
  0x14   :  { %v71_v26 = vld [vmem:[#allocation5 + $0xe0] sm:$0xff]  ;;  %v70_v27 = vld [vmem:[#allocation5 + $0xd8] sm:$0xff]  ;;  %v69_v28 = vld [vmem:[#allocation5 + $0xd0] sm:$0xff] }
  0x15   :  { %111 = vmatpush.msra.mxu1 %v57_v7  ;;  %130 = vmatpush.msra.mxu2 %v77_v20  ;;  %v68_v29 = vld [vmem:[#allocation5 + $0xc8] sm:$0xff]  ;;  %v67_v30 = vld [vmem:[#allocation5 + $0xc0] sm:$0xff]  ;;  %v66_v31 = vld [vmem:[#allocation5 + $0xb8] sm:$0xff] }
  0x16   :  { %v174_v32 = vld [vmem:[#allocation5 + $0x10] ss:$0 sm:$0xff]  ;;  %v64_v37 = vld [vmem:[#allocation5 + $0xa8] sm:$0xff]  ;;  %v63_v38 = vld [vmem:[#allocation5 + $0xa0] sm:$0xff] }
  0x17   :  { %112 = vmatpush.msra.mxu1 %v56_v8  ;;  %131 = vmatpush.msra.mxu2 %v76_v21  ;;  %v65_v36 = vld [vmem:[#allocation5 + $0xb0] sm:$0xff]  ;;  %v175_v39 = vld [vmem:[#allocation5 + $0x98] ss:$0 sm:$0xff]  ;;  %v176_v43 = vld [vmem:[#allocation5 + $0x120] ss:$0 sm:$0xff] }
  0x19   :  { %113 = vmatpush.msra.mxu1 %v55_v9  ;;  %132 = vmatpush.msra.mxu2 %v75_v22 }
  0x1b   :  { %114 = vmatpush.msra.mxu1 %v54_v10  ;;  %133 = vmatpush.msra.mxu2 %v74_v23 }
  0x1d   :  { %115 = vmatpush.msra.mxu1 %v53_v11  ;;  %134 = vmatpush.msra.mxu2 %v73_v24 }
  0x1f   :  { %116 = vmatpush.msra.mxu1 %v52_v12  ;;  %135 = vmatpush.msra.mxu2 %v72_v25 }
  0x21   :  { %117 = vmatpush.msra.mxu1 %v51_v13  ;;  %136 = vmatpush.msra.mxu2 %v71_v26 }
  0x23   :  { %118 = vmatpush.msra.mxu1 %v50_v14  ;;  %137 = vmatpush.msra.mxu2 %v70_v27 }
  0x25   :  { %119 = vmatpush.msra.mxu1 %v49_v15  ;;  %138 = vmatpush.msra.mxu2 %v69_v28 }
  0x27   :  { %120 = vmatpush.msra.mxu1 %v48_v16  ;;  %139 = vmatpush.msra.mxu2 %v68_v29 }
  0x29   :  { %121 = vmatpush.msra.mxu1 %v47_v17  ;;  %140 = vmatpush.msra.mxu2 %v67_v30 }
  0x2b   :  { %122 = vmatpush.msra.mxu1 %v46_v18  ;;  %141 = vmatpush.msra.mxu2 %v66_v31 }
  0x2d   :  { %142 = vmatpush.msra.mxu2 %v65_v36 }
  0x2f   :  { %143 = vmatpush.msra.mxu2 %v64_v37 }
  0x31   :  { %144 = vmatpush.msra.mxu2 %v63_v38 }
  0x8c   :  { %v102_v33 = vpop.f32.mrf.mxu0 }
  0x8d   :  { %v103_v34 = vadd.f32 %v174_v32, %v102_v33 }
  0x8f   :  { %v105_v35 = vmax.f32 %v103_v34, 0.0 }
  0x91   :  { %123 = vmatmul.f32.vlgmr.msra.gmra.mxu1 %v105_v35 }
 0x10e   :  { %v124_v40 = vpop.f32.mrf.mxu1 }
 0x10f   :  { %v125_v41 = vadd.f32 %v175_v39, %v124_v40 }
 0x111   :  { %v127_v42 = vmax.f32 %v125_v41, 0.0 }
 0x113   :  { %145 = vmatmul.f32.vlgmr.msra.gmra.mxu2 %v127_v42 }
 0x196   :  { %v146_v44 = vpop.f32.mrf.mxu2 }
 0x197   :  { %v147_v45 = vadd.f32 %v176_v43, %v146_v44 }
 0x199   :  { %149 = vst [vmem:[#allocation7] sm:$0xff] %v147_v45 }
 0x19a   :  { %160 = dma.vmem_to_hbm [thread:$0]  %s156_s1, 128, %s158_s23, [#allocation4]  }
 0x19b   :  { %253 = dma.done.wait [#allocation4], 128  }
 0x19c   :  { %254 = vsyncadd [#allocation4], 4294967168 }
 0x19d   :  { %165 = vsyncpa [#allocation3], 1 }
 0x19e   :  { %166 = vsyncpa [#allocation6], 1 }
 0x19f   :  { %167 = vsyncpa [#allocation4], 1 }

</bundles_post_ra>
